<compile_context>
chip_gen: v7x
topology: tpu7x:2x2x1
jax: 0.10.0
libtpu: 0.0.40
codegen_flags: <defaults>
</compile_context>

<pallas_src>
import jax
import jax.numpy as jnp
from jax.experimental import pallas as pl
from jax.experimental.pallas import tpu as pltpu


def _make_activation(name):
    if name == "relu":
        return lambda h: jnp.maximum(h, 0.0)
    if name == "sigmoid":
        return jax.nn.sigmoid          # EUP transcendental, f32
    if name == "tanh":
        return jnp.tanh                # EUP transcendental, f32
    raise ValueError(f"{name} is not valid for this model")


def make_mlp_kernel(activation):
    act = _make_activation(activation)

    def mlp_kernel(x_ref,
                   w1_ref, b1_ref,
                   w2_ref, b2_ref,
                   w3_ref, b3_ref,
                   w4_ref, b4_ref,
                   o_ref):
        """Fused forward: (Linear + act) x3 -> Linear for one batch tile."""
        # f32 -> bf16 cast on the VPU right before the MXU.
        x = x_ref[...].astype(jnp.bfloat16)

        h = jnp.dot(x, w1_ref[...],
                    preferred_element_type=jnp.float32) + b1_ref[...]
        h = act(h)

        h = jnp.dot(h.astype(jnp.bfloat16), w2_ref[...],
                    preferred_element_type=jnp.float32) + b2_ref[...]
        h = act(h)

        h = jnp.dot(h.astype(jnp.bfloat16), w3_ref[...],
                    preferred_element_type=jnp.float32) + b3_ref[...]
        h = act(h)

        out = jnp.dot(h.astype(jnp.bfloat16), w4_ref[...],
                      preferred_element_type=jnp.float32) + b4_ref[...]
        o_ref[...] = out.astype(o_ref.dtype)

    return mlp_kernel


def _choose_batch_tile(B, bytes_per_row, *, target_rows=512, vmem_budget=8 << 20):
    """Batch tile: multiple of 8 (sublane), divides B, ~512 rows per grid step
    (per-step overhead amortized, DMAs pipeline), capped so the
    double-buffered x / o tiles stay well inside v7x's 64 MiB VMEM."""
    if B % 8 != 0:
        return B                                   # full-dim block is always legal
    cap = vmem_budget // max(1, 2 * bytes_per_row)  # 2x for double-buffering
    tile = min(B, target_rows, max(8, cap))
    tile -= tile % 8
    tile = max(tile, 8)
    while B % tile != 0:
        tile -= 8
    return tile


def idac_forward(x, params, *, activation="relu", batch_tile=None):
    """Run the fused MLP Pallas kernel.

    x: (B, input_shape) float32
    params: dict with w1..w4 stored (in, out) f32 and b1..b4 (1, out) f32
    """
    B, F_in = x.shape
    w1, b1 = params["w1"], params["b1"]
    w2, b2 = params["w2"], params["b2"]
    w3, b3 = params["w3"], params["b3"]
    w4, b4 = params["w4"], params["b4"]
    H = w1.shape[1]
    F_out = w4.shape[1]

    if batch_tile is None:
        batch_tile = _choose_batch_tile(B, (F_in + F_out) * 4)
    assert B % batch_tile == 0, "batch_tile must divide B"
    grid = (B // batch_tile,)

    # Weights to bf16 once (tiny one-time op); biases stay f32 and are added
    # to the f32 accumulator inside the kernel.
    w1b, w2b, w3b, w4b = (w.astype(jnp.bfloat16) for w in (w1, w2, w3, w4))

    # x / o tiled along batch; constant index_map => weights & biases resident.
    x_spec = pl.BlockSpec((batch_tile, F_in), lambda i: (i, 0))
    o_spec = pl.BlockSpec((batch_tile, F_out), lambda i: (i, 0))

    def resident(shape):
        return pl.BlockSpec(shape, lambda i: (0, 0))

    flops = 2 * B * (F_in * H + 2 * H * H + H * F_out)
    transcendentals = 0 if activation == "relu" else 3 * B * H
    bytes_accessed = (
        B * F_in * 4 + B * F_out * 4                         # activations in/out
        + (w1b.size + w2b.size + w3b.size + w4b.size) * 2    # bf16 weights
        + (b1.size + b2.size + b3.size + b4.size) * 4)       # f32 biases
    cost = pl.CostEstimate(flops=flops, transcendentals=transcendentals,
                           bytes_accessed=bytes_accessed)

    return pl.pallas_call(
        make_mlp_kernel(activation),
        out_shape=jax.ShapeDtypeStruct((B, F_out), jnp.float32),
        grid_spec=pl.GridSpec(
            grid=grid,
            in_specs=[
                x_spec,
                resident(w1b.shape), resident(b1.shape),
                resident(w2b.shape), resident(b2.shape),
                resident(w3b.shape), resident(b3.shape),
                resident(w4b.shape), resident(b4.shape),
            ],
            out_specs=o_spec,
        ),
        compiler_params=pltpu.CompilerParams(
            dimension_semantics=("parallel",)),
        cost_estimate=cost,
    )(x, w1b, b1, w2b, b2, w3b, b3, w4b, b4)


def init_params(key, input_shape, hidden_units, output_shape):
    """Deterministic synthetic init, PyTorch-Linear style, stored as (in, out)."""
    ks = jax.random.split(key, 8)
    dims = [(input_shape, hidden_units),
            (hidden_units, hidden_units),
            (hidden_units, hidden_units),
            (hidden_units, output_shape)]
    params = {}
    for idx, (fan_in, fan_out) in enumerate(dims, start=1):
        bound = 1.0 / jnp.sqrt(fan_in)
        w = jax.random.uniform(ks[2 * (idx - 1)], (fan_in, fan_out),
                               jnp.float32, -bound, bound)
        b = jax.random.uniform(ks[2 * (idx - 1) + 1], (1, fan_out),
                               jnp.float32, -bound, bound)
        params[f"w{idx}"] = w
        params[f"b{idx}"] = b
    return params


def reference_forward(x, params, activation="relu"):
    """Plain-JAX reference using the same bf16-in / f32-accumulate recipe."""
    act = _make_activation(activation)

    def lin(h, w, b):
        return jnp.dot(h.astype(jnp.bfloat16), w.astype(jnp.bfloat16),
                       preferred_element_type=jnp.float32) + b

    h = act(lin(x, params["w1"], params["b1"]))
    h = act(lin(h, params["w2"], params["b2"]))
    h = act(lin(h, params["w3"], params["b3"]))
    return lin(h, params["w4"], params["b4"])


if __name__ == "__main__":
    key = jax.random.PRNGKey(0)
    k_x, k_p = jax.random.split(key)

    batch = 256
    input_shape = 16
    hidden_units = 32
    output_shape = 4

    x = jax.random.normal(k_x, (batch, input_shape), jnp.float32)
    params = init_params(k_p, input_shape, hidden_units, output_shape)

    out = idac_forward(x, params, activation="relu")
    out = jax.block_until_ready(out)

    ref = reference_forward(x, params, activation="relu")
    assert out.shape == (batch, output_shape)
    assert jnp.allclose(out, ref, atol=2e-3, rtol=2e-3), "mismatch vs reference"

    print("KERNEL_OK")
</pallas_src>

<mosaic_0001>
module attributes {stable_mosaic.version = 11 : i64} {
  func.func @mlp_kernel(%arg0: i32, %arg1: memref<256x16xf32, #tpu.memory_space<vmem>>, %arg2: memref<16x32xbf16, #tpu.memory_space<vmem>>, %arg3: memref<1x32xf32, #tpu.memory_space<vmem>>, %arg4: memref<32x32xbf16, #tpu.memory_space<vmem>>, %arg5: memref<1x32xf32, #tpu.memory_space<vmem>>, %arg6: memref<32x32xbf16, #tpu.memory_space<vmem>>, %arg7: memref<1x32xf32, #tpu.memory_space<vmem>>, %arg8: memref<32x4xbf16, #tpu.memory_space<vmem>>, %arg9: memref<1x4xf32, #tpu.memory_space<vmem>>, %arg10: memref<256x4xf32, #tpu.memory_space<vmem>>) attributes {dimension_semantics = [#tpu.dimension_semantics<parallel>], iteration_bounds = array<i64: 1>, scalar_prefetch = 0 : i64, scratch_operands = 0 : i64, tpu.core_type = #tpu.core_type<tc>, window_params = [{transform_indices = @transform_0, window_bounds = array<i64: 256, 16>}, {pipeline_mode = #tpu.pipeline_mode<synchronous>, transform_indices = @transform_1, window_bounds = array<i64: 16, 32>}, {pipeline_mode = #tpu.pipeline_mode<synchronous>, transform_indices = @transform_2, window_bounds = array<i64: 1, 32>}, {pipeline_mode = #tpu.pipeline_mode<synchronous>, transform_indices = @transform_3, window_bounds = array<i64: 32, 32>}, {pipeline_mode = #tpu.pipeline_mode<synchronous>, transform_indices = @transform_4, window_bounds = array<i64: 1, 32>}, {pipeline_mode = #tpu.pipeline_mode<synchronous>, transform_indices = @transform_5, window_bounds = array<i64: 32, 32>}, {pipeline_mode = #tpu.pipeline_mode<synchronous>, transform_indices = @transform_6, window_bounds = array<i64: 1, 32>}, {pipeline_mode = #tpu.pipeline_mode<synchronous>, transform_indices = @transform_7, window_bounds = array<i64: 32, 4>}, {pipeline_mode = #tpu.pipeline_mode<synchronous>, transform_indices = @transform_8, window_bounds = array<i64: 1, 4>}, {transform_indices = @transform_9, window_bounds = array<i64: 256, 4>}]} {
    %c0 = arith.constant 0 : index
    %c0_0 = arith.constant 0 : index
    %0 = vector.load %arg1[%c0, %c0_0] : memref<256x16xf32, #tpu.memory_space<vmem>>, vector<256x16xf32>
    %1 = arith.truncf %0 : vector<256x16xf32> to vector<256x16xbf16>
    %c0_1 = arith.constant 0 : index
    %c0_2 = arith.constant 0 : index
    %2 = vector.load %arg2[%c0_1, %c0_2] : memref<16x32xbf16, #tpu.memory_space<vmem>>, vector<16x32xbf16>
    %cst = arith.constant dense<0.000000e+00> : vector<256x32xf32>
    %3 = tpu.matmul %1, %2, %cst {dimension_numbers = #tpu.dot_dimension_numbers<[1], [0], [0], [1], [0, 0, 1, 1], [], []>} : vector<256x16xbf16>, vector<16x32xbf16>, vector<256x32xf32> -> vector<256x32xf32>
    %c0_3 = arith.constant 0 : index
    %c0_4 = arith.constant 0 : index
    %4 = vector.load %arg3[%c0_3, %c0_4] : memref<1x32xf32, #tpu.memory_space<vmem>>, vector<1x32xf32>
    %5 = vector.broadcast %4 : vector<1x32xf32> to vector<256x32xf32>
    %6 = arith.addf %3, %5 : vector<256x32xf32>
    %cst_5 = arith.constant 0.000000e+00 : f32
    %7 = vector.broadcast %cst_5 : f32 to vector<256x32xf32>
    %8 = arith.maximumf %6, %7 : vector<256x32xf32>
    %9 = arith.truncf %8 : vector<256x32xf32> to vector<256x32xbf16>
    %c0_6 = arith.constant 0 : index
    %c0_7 = arith.constant 0 : index
    %10 = vector.load %arg4[%c0_6, %c0_7] : memref<32x32xbf16, #tpu.memory_space<vmem>>, vector<32x32xbf16>
    %cst_8 = arith.constant dense<0.000000e+00> : vector<256x32xf32>
    %11 = tpu.matmul %9, %10, %cst_8 {dimension_numbers = #tpu.dot_dimension_numbers<[1], [0], [0], [1], [0, 0, 1, 1], [], []>} : vector<256x32xbf16>, vector<32x32xbf16>, vector<256x32xf32> -> vector<256x32xf32>
    %c0_9 = arith.constant 0 : index
    %c0_10 = arith.constant 0 : index
    %12 = vector.load %arg5[%c0_9, %c0_10] : memref<1x32xf32, #tpu.memory_space<vmem>>, vector<1x32xf32>
    %13 = vector.broadcast %12 : vector<1x32xf32> to vector<256x32xf32>
    %14 = arith.addf %11, %13 : vector<256x32xf32>
    %cst_11 = arith.constant 0.000000e+00 : f32
    %15 = vector.broadcast %cst_11 : f32 to vector<256x32xf32>
    %16 = arith.maximumf %14, %15 : vector<256x32xf32>
    %17 = arith.truncf %16 : vector<256x32xf32> to vector<256x32xbf16>
    %c0_12 = arith.constant 0 : index
    %c0_13 = arith.constant 0 : index
    %18 = vector.load %arg6[%c0_12, %c0_13] : memref<32x32xbf16, #tpu.memory_space<vmem>>, vector<32x32xbf16>
    %cst_14 = arith.constant dense<0.000000e+00> : vector<256x32xf32>
    %19 = tpu.matmul %17, %18, %cst_14 {dimension_numbers = #tpu.dot_dimension_numbers<[1], [0], [0], [1], [0, 0, 1, 1], [], []>} : vector<256x32xbf16>, vector<32x32xbf16>, vector<256x32xf32> -> vector<256x32xf32>
    %c0_15 = arith.constant 0 : index
    %c0_16 = arith.constant 0 : index
    %20 = vector.load %arg7[%c0_15, %c0_16] : memref<1x32xf32, #tpu.memory_space<vmem>>, vector<1x32xf32>
    %21 = vector.broadcast %20 : vector<1x32xf32> to vector<256x32xf32>
    %22 = arith.addf %19, %21 : vector<256x32xf32>
    %cst_17 = arith.constant 0.000000e+00 : f32
    %23 = vector.broadcast %cst_17 : f32 to vector<256x32xf32>
    %24 = arith.maximumf %22, %23 : vector<256x32xf32>
    %25 = arith.truncf %24 : vector<256x32xf32> to vector<256x32xbf16>
    %c0_18 = arith.constant 0 : index
    %c0_19 = arith.constant 0 : index
    %26 = vector.load %arg8[%c0_18, %c0_19] : memref<32x4xbf16, #tpu.memory_space<vmem>>, vector<32x4xbf16>
    %cst_20 = arith.constant dense<0.000000e+00> : vector<256x4xf32>
    %27 = tpu.matmul %25, %26, %cst_20 {dimension_numbers = #tpu.dot_dimension_numbers<[1], [0], [0], [1], [0, 0, 1, 1], [], []>} : vector<256x32xbf16>, vector<32x4xbf16>, vector<256x4xf32> -> vector<256x4xf32>
    %c0_21 = arith.constant 0 : index
    %c0_22 = arith.constant 0 : index
    %28 = vector.load %arg9[%c0_21, %c0_22] : memref<1x4xf32, #tpu.memory_space<vmem>>, vector<1x4xf32>
    %29 = vector.broadcast %28 : vector<1x4xf32> to vector<256x4xf32>
    %30 = arith.addf %27, %29 : vector<256x4xf32>
    %c0_23 = arith.constant 0 : index
    %c0_24 = arith.constant 0 : index
    %31 = vector.load %arg10[%c0_23, %c0_24] : memref<256x4xf32, #tpu.memory_space<vmem>>, vector<256x4xf32>
    tpu.vector_store %arg10[%c0_23, %c0_24], %30 {strides = array<i32>} : memref<256x4xf32, #tpu.memory_space<vmem>>, vector<256x4xf32>,
    return
  }
  func.func @transform_0(%arg0: i32) -> (i32, i32) {
    %c0_i32 = arith.constant 0 : i32
    %c0_i32_0 = arith.constant 0 : i32
    return %arg0, %c0_i32 : i32, i32
  }
  func.func @transform_1(%arg0: i32) -> (i32, i32) {
    %c0_i32 = arith.constant 0 : i32
    %c0_i32_0 = arith.constant 0 : i32
    %c0_i32_1 = arith.constant 0 : i32
    return %c0_i32, %c0_i32_0 : i32, i32
  }
  func.func @transform_2(%arg0: i32) -> (i32, i32) {
    %c0_i32 = arith.constant 0 : i32
    %c0_i32_0 = arith.constant 0 : i32
    %c0_i32_1 = arith.constant 0 : i32
    return %c0_i32, %c0_i32_0 : i32, i32
  }
  func.func @transform_3(%arg0: i32) -> (i32, i32) {
    %c0_i32 = arith.constant 0 : i32
    %c0_i32_0 = arith.constant 0 : i32
    %c0_i32_1 = arith.constant 0 : i32
    return %c0_i32, %c0_i32_0 : i32, i32
  }
  func.func @transform_4(%arg0: i32) -> (i32, i32) {
    %c0_i32 = arith.constant 0 : i32
    %c0_i32_0 = arith.constant 0 : i32
    %c0_i32_1 = arith.constant 0 : i32
    return %c0_i32, %c0_i32_0 : i32, i32
  }
  func.func @transform_5(%arg0: i32) -> (i32, i32) {
    %c0_i32 = arith.constant 0 : i32
    %c0_i32_0 = arith.constant 0 : i32
    %c0_i32_1 = arith.constant 0 : i32
    return %c0_i32, %c0_i32_0 : i32, i32
  }
  func.func @transform_6(%arg0: i32) -> (i32, i32) {
    %c0_i32 = arith.constant 0 : i32
    %c0_i32_0 = arith.constant 0 : i32
    %c0_i32_1 = arith.constant 0 : i32
    return %c0_i32, %c0_i32_0 : i32, i32
  }
  func.func @transform_7(%arg0: i32) -> (i32, i32) {
    %c0_i32 = arith.constant 0 : i32
    %c0_i32_0 = arith.constant 0 : i32
    %c0_i32_1 = arith.constant 0 : i32
    return %c0_i32, %c0_i32_0 : i32, i32
  }
  func.func @transform_8(%arg0: i32) -> (i32, i32) {
    %c0_i32 = arith.constant 0 : i32
    %c0_i32_0 = arith.constant 0 : i32
    %c0_i32_1 = arith.constant 0 : i32
    return %c0_i32, %c0_i32_0 : i32, i32
  }
  func.func @transform_9(%arg0: i32) -> (i32, i32) {
    %c0_i32 = arith.constant 0 : i32
    %c0_i32_0 = arith.constant 0 : i32
    return %arg0, %c0_i32 : i32, i32
  }
}

</mosaic_0001>

<bundles_post_ra>
// kernel: tpu_custom_call.1
= control target key start
LH: loop header
LB: loop body
LE: loop exit
PB: predicated region body
PF: predicated region fallthrough
CT: control target
= control target key end

     0   :  { %vm96_vm0 = vcmask 130048   ;;  %vm377_vm1 = vcmask 261120   ;;  %vm1147_vm2 = vcmask 31744   ;;  %s1986_s1 = inlined_call_operand.vmem [shape: bf16[16,32], index: 1, kind: input, shape index: {}]   ;;  %s1987_s0 = inlined_call_operand.vmem [shape: f32[256,16], index: 0, kind: input, shape index: {}]   ;;  %s1988_s3 = inlined_call_operand.vmem [shape: bf16[32,32], index: 3, kind: input, shape index: {}]   ;;  %s1989_s5 = inlined_call_operand.vmem [shape: bf16[32,32], index: 5, kind: input, shape index: {}]   ;;  %s1990_s2 = inlined_call_operand.vmem [shape: f32[1,32], index: 2, kind: input, shape index: {}]   ;;  %s1991_s7 = inlined_call_operand.vmem [shape: bf16[32,4], index: 7, kind: input, shape index: {}]   ;;  %s1992_s4 = inlined_call_operand.vmem [shape: f32[1,32], index: 4, kind: input, shape index: {}]   ;;  %s1993_s6 = inlined_call_operand.vmem [shape: f32[1,32], index: 6, kind: input, shape index: {}]   ;;  %s1994_s8 = inlined_call_operand.vmem [shape: f32[1,4], index: 8, kind: input, shape index: {}]   ;;  %s1995_s9 = inlined_call_operand.vmem [shape: f32[256,4], index: 9, kind: output, shape index: {}]  }
   0x1   :  { %v1472_v0 = vld [vmem:[%s1986_s1] sm:$0xff]   ;;  %v34_v2 = vld [vmem:[%s1987_s0 + $0x8] sm:$0xff]  ;;  %v35_v3 = vld [vmem:[%s1987_s0 + $0x10] sm:$0xff] }
   0x2   :  { %v33_v1 = vld [vmem:[%s1987_s0] sm:$0xff]  ;;  %1330 = vmatprep.subr.bf16.mxu0 %v1472_v0  ;;  %v36_v5 = vld [vmem:[%s1987_s0 + $0x18] sm:$0xff]  ;;  %v38_v7 = vld [vmem:[%s1987_s0 + $0x28] sm:$0xff] }
   0x3   :  { %v65_v4 = vpack.c.bf16 %v34_v2, %v33_v1  ;;  %v37_v6 = vld [vmem:[%s1987_s0 + $0x20] sm:$0xff]  ;;  %1331 = vmatpush3.bf16.msra.mxu0 %v1472_v0  ;;  %v66_v8 = vpack.c.bf16 %v36_v5, %v35_v3  ;;  %v39_v10 = vld [vmem:[%s1987_s0 + $0x30] sm:$0xff]  ;;  %v40_v11 = vld [vmem:[%s1987_s0 + $0x38] sm:$0xff] }
   0x4   :  { %v67_v9 = vpack.c.bf16 %v38_v7, %v37_v6  ;;  %v41_v12 = vld [vmem:[%s1987_s0 + $0x40] sm:$0xff]  ;;  %v42_v13 = vld [vmem:[%s1987_s0 + $0x48] sm:$0xff]  ;;  %v68_v14 = vpack.c.bf16 %v40_v11, %v39_v10  ;;  %v43_v16 = vld [vmem:[%s1987_s0 + $0x50] sm:$0xff] }
   0x5   :  { %1332 = vmatprep.mubr.msk.bf16.mxu0 %vm96_vm0, %v65_v4  ;;  %v69_v15 = vpack.c.bf16 %v42_v13, %v41_v12  ;;  %v44_v17 = vld [vmem:[%s1987_s0 + $0x58] sm:$0xff]  ;;  %v45_v18 = vld [vmem:[%s1987_s0 + $0x60] sm:$0xff]  ;;  %v46_v19 = vld [vmem:[%s1987_s0 + $0x68] sm:$0xff] }
   0x6   :  { %1333 = vmatmul.mubr.msk.bf16.vlgmr.msra.gmra.mrb[0].mxu0 %vm96_vm0, %v66_v8  ;;  %v70_v20 = vpack.c.bf16 %v44_v17, %v43_v16  ;;  %v71_v21 = vpack.c.bf16 %v46_v19, %v45_v18  ;;  %v47_v22 = vld [vmem:[%s1987_s0 + $0x70] sm:$0xff]  ;;  %v48_v23 = vld [vmem:[%s1987_s0 + $0x78] sm:$0xff]  ;;  %v49_v24 = vld [vmem:[%s1987_s0 + $0x80] sm:$0xff] }
   0x7   :  { %1336 = vmatprep.mubr.msk.bf16.mxu0 %vm96_vm0, %v67_v9  ;;  %v50_v25 = vld [vmem:[%s1987_s0 + $0x88] sm:$0xff]  ;;  %v72_v26 = vpack.c.bf16 %v48_v23, %v47_v22  ;;  %v51_v28 = vld [vmem:[%s1987_s0 + $0x90] sm:$0xff]  ;;  %v52_v29 = vld [vmem:[%s1987_s0 + $0x98] sm:$0xff] }
   0x8   :  { %v73_v27 = vpack.c.bf16 %v50_v25, %v49_v24  ;;  %v53_v30 = vld [vmem:[%s1987_s0 + $0xa0] sm:$0xff]  ;;  %v54_v31 = vld [vmem:[%s1987_s0 + $0xa8] sm:$0xff]  ;;  %v74_v32 = vpack.c.bf16 %v52_v29, %v51_v28  ;;  %v55_v34 = vld [vmem:[%s1987_s0 + $0xb0] sm:$0xff] }
   0x9   :  { %v75_v33 = vpack.c.bf16 %v54_v31, %v53_v30  ;;  %v56_v35 = vld [vmem:[%s1987_s0 + $0xb8] sm:$0xff]  ;;  %v57_v36 = vld [vmem:[%s1987_s0 + $0xc0] sm:$0xff]  ;;  %v58_v37 = vld [vmem:[%s1987_s0 + $0xc8] sm:$0xff] }
   0xa   :  { %v76_v38 = vpack.c.bf16 %v56_v35, %v55_v34  ;;  %v77_v39 = vpack.c.bf16 %v58_v37, %v57_v36  ;;  %v59_v40 = vld [vmem:[%s1987_s0 + $0xd0] sm:$0xff]  ;;  %v60_v41 = vld [vmem:[%s1987_s0 + $0xd8] sm:$0xff]  ;;  %v61_v42 = vld [vmem:[%s1987_s0 + $0xe0] sm:$0xff] }
   0xb   :  { %v62_v43 = vld [vmem:[%s1987_s0 + $0xe8] sm:$0xff]  ;;  %v78_v44 = vpack.c.bf16 %v60_v41, %v59_v40  ;;  %v63_v46 = vld [vmem:[%s1987_s0 + $0xf0] sm:$0xff]  ;;  %v64_v47 = vld [vmem:[%s1987_s0 + $0xf8] sm:$0xff] }
   0xc   :  { %v79_v45 = vpack.c.bf16 %v62_v43, %v61_v42  ;;  %v80_v48 = vpack.c.bf16 %v64_v47, %v63_v46  ;;  %v1473_v49 = vld [vmem:[%s1988_s3] sm:$0xff]   ;;  %v1474_v50 = vld [vmem:[%s1988_s3 + $0x8] sm:$0xff]  }
   0xd   :  { %1364 = vmatprep.subr.bf16.mxu1 %v1473_v49  ;;  %v1475_v51 = vld [vmem:[%s1989_s5] sm:$0xff]   ;;  %v1476_v52 = vld [vmem:[%s1989_s5 + $0x8] sm:$0xff]  }
   0xe   :  { %1337 = vmatmul.mubr.msk.bf16.gmra.mrb[4].mxu0 %vm96_vm0, %v68_v14  ;;  %1365 = vmatpush3.bf16.msra.mxu1 %v1473_v49  ;;  %v1659_v53 = vld [vmem:[%s1990_s2] ss:$0 sm:$0xff] }
   0xf   :  { %1340 = vmatprep.mubr.msk.bf16.mxu0 %vm96_vm0, %v69_v15  ;;  %1366 = vmatprep.subr.bf16.mxu1 %v1474_v50 }
  0x10   :  { %1400 = vmatprep.subr.bf16.mxu0 %v1475_v51 }
  0x11   :  { %1401 = vmatpush3.bf16.msra.mxu0 %v1475_v51 }
  0x12   :  { %1367 = vmatpush3.bf16.msra.mxu1 %v1474_v50  ;;  %1402 = vmatprep.subr.bf16.mxu0 %v1476_v52 }
  0x15   :  { %1403 = vmatpush3.bf16.msra.mxu0 %v1476_v52 }
  0x16   :  { %1341 = vmatmul.mubr.msk.bf16.gmra.mrb[8].mxu0 %vm96_vm0, %v70_v20 }
  0x17   :  { %1344 = vmatprep.mubr.msk.bf16.mxu0 %vm96_vm0, %v71_v21 }
  0x1e   :  { %1345 = vmatmul.mubr.msk.bf16.gmra.mrb[12].mxu0 %vm96_vm0, %v72_v26 }
  0x1f   :  { %1348 = vmatprep.mubr.msk.bf16.mxu0 %vm96_vm0, %v73_v27 }
  0x26   :  { %1349 = vmatmul.mubr.msk.bf16.gmra.mrb[16].mxu0 %vm96_vm0, %v74_v32 }
  0x27   :  { %1352 = vmatprep.mubr.msk.bf16.mxu0 %vm96_vm0, %v75_v33 }
  0x2e   :  { %1353 = vmatmul.mubr.msk.bf16.gmra.mrb[20].mxu0 %vm96_vm0, %v76_v38 }
  0x2f   :  { %1356 = vmatprep.mubr.msk.bf16.mxu0 %vm96_vm0, %v77_v39 }
  0x36   :  { %1357 = vmatmul.mubr.msk.bf16.gmra.mrb[24].mxu0 %vm96_vm0, %v78_v44 }
  0x37   :  { %1360 = vmatprep.mubr.msk.bf16.mxu0 %vm96_vm0, %v79_v45 }
  0x3e   :  { %1361 = vmatmul.mubr.msk.bf16.gmra.mrb[28].mxu0 %vm96_vm0, %v80_v48 }
  0xd9   :  { %v1334_v54 = vpop.f32.mrb[0].mxu0 }
  0xda   :  { %v188_v55 = vadd.f32 %v1334_v54, %v1659_v53  ;;  %v179_v56 = vpop.f32.mrb[1].mxu0 }
  0xdb   :  { %v180_v57 = vadd.f32 %v1659_v53, %v179_v56  ;;  %v1335_v58 = vpop.f32.mrb[2].mxu0 }
  0xdc   :  { %v191_v59 = vadd.f32 %v1335_v58, %v1659_v53  ;;  %v182_v60 = vpop.f32.mrb[3].mxu0  ;;  %v308_v62 = vmax.f32 %v188_v55, 0.0 }
  0xdd   :  { %v183_v61 = vadd.f32 %v1659_v53, %v182_v60  ;;  %v306_v0 = vmax.f32 %v180_v57, 0.0 }
  0xde   :  { %v309_v63 = vmax.f32 %v191_v59, 0.0 }
  0xdf   :  { %v307_v1 = vmax.f32 %v183_v61, 0.0 }
  0xe0   :  { %v339_v2 = vpack.c.bf16 %v309_v63, %v308_v62 }
  0xe1   :  { %v1338_v3 = vpop.f32.mrb[4].mxu0  ;;  %v338_v4 = vpack.c.bf16 %v307_v1, %v306_v0 }
  0xe2   :  { %v204_v5 = vadd.f32 %v1338_v3, %v1659_v53  ;;  %v195_v6 = vpop.f32.mrb[5].mxu0 }
  0xe3   :  { %v196_v7 = vadd.f32 %v1659_v53, %v195_v6  ;;  %v1339_v8 = vpop.f32.mrb[6].mxu0  ;;  %1368 = vmatprep.mubr.msk.bf16.mxu1 %vm377_vm1, %v338_v4 }
  0xe4   :  { %v207_v9 = vadd.f32 %v1339_v8, %v1659_v53  ;;  %v198_v10 = vpop.f32.mrb[7].mxu0  ;;  %1369 = vmatmul.mubr.msk.bf16.vlgmr.msra.gmra.mrb[0].mxu1 %vm377_vm1, %v339_v2  ;;  %v312_v12 = vmax.f32 %v204_v5, 0.0 }
  0xe5   :  { %v199_v11 = vadd.f32 %v1659_v53, %v198_v10  ;;  %v310_v14 = vmax.f32 %v196_v7, 0.0 }
  0xe6   :  { %v313_v13 = vmax.f32 %v207_v9, 0.0 }
  0xe7   :  { %v311_v15 = vmax.f32 %v199_v11, 0.0 }
  0xe8   :  { %v341_v16 = vpack.c.bf16 %v313_v13, %v312_v12 }
  0xe9   :  { %v340_v17 = vpack.c.bf16 %v311_v15, %v310_v14  ;;  %v1342_v18 = vpop.f32.mrb[8].mxu0 }
  0xea   :  { %v220_v19 = vadd.f32 %v1342_v18, %v1659_v53  ;;  %v211_v20 = vpop.f32.mrb[9].mxu0 }
  0xeb   :  { %v212_v21 = vadd.f32 %v1659_v53, %v211_v20  ;;  %v1343_v22 = vpop.f32.mrb[10].mxu0  ;;  %1372 = vmatprep.mubr.msk.bf16.mxu1 %vm377_vm1, %v340_v17 }
  0xec   :  { %v223_v23 = vadd.f32 %v1343_v22, %v1659_v53  ;;  %v214_v24 = vpop.f32.mrb[11].mxu0  ;;  %1373 = vmatmul.mubr.msk.bf16.gmra.mrb[4].mxu1 %vm377_vm1, %v341_v16  ;;  %v316_v26 = vmax.f32 %v220_v19, 0.0 }
  0xed   :  { %v215_v25 = vadd.f32 %v1659_v53, %v214_v24  ;;  %v314_v28 = vmax.f32 %v212_v21, 0.0 }
  0xee   :  { %v317_v27 = vmax.f32 %v223_v23, 0.0 }
  0xef   :  { %v315_v29 = vmax.f32 %v215_v25, 0.0 }
  0xf0   :  { %v343_v30 = vpack.c.bf16 %v317_v27, %v316_v26 }
  0xf1   :  { %v342_v31 = vpack.c.bf16 %v315_v29, %v314_v28  ;;  %v1346_v32 = vpop.f32.mrb[12].mxu0 }
  0xf2   :  { %v236_v33 = vadd.f32 %v1346_v32, %v1659_v53  ;;  %v227_v34 = vpop.f32.mrb[13].mxu0 }
  0xf3   :  { %v228_v35 = vadd.f32 %v1659_v53, %v227_v34  ;;  %v1347_v36 = vpop.f32.mrb[14].mxu0  ;;  %1376 = vmatprep.mubr.msk.bf16.mxu1 %vm377_vm1, %v342_v31 }
  0xf4   :  { %v239_v37 = vadd.f32 %v1347_v36, %v1659_v53  ;;  %v230_v38 = vpop.f32.mrb[15].mxu0  ;;  %1377 = vmatmul.mubr.msk.bf16.gmra.mrb[8].mxu1 %vm377_vm1, %v343_v30  ;;  %v320_v40 = vmax.f32 %v236_v33, 0.0 }
  0xf5   :  { %v231_v39 = vadd.f32 %v1659_v53, %v230_v38  ;;  %v318_v42 = vmax.f32 %v228_v35, 0.0 }
  0xf6   :  { %v321_v41 = vmax.f32 %v239_v37, 0.0 }
  0xf7   :  { %v319_v43 = vmax.f32 %v231_v39, 0.0  ;;  %v1477_v39 = vld [vmem:[%s1991_s7] sm:$0xff]  }
  0xf8   :  { %v345_v44 = vpack.c.bf16 %v321_v41, %v320_v40  ;;  %v1478_v40 = vld [vmem:[%s1991_s7 + $0x8] sm:$0xff]   ;;  %1436 = vmatprep.subr.bf16.mxu1 %v1477_v39 }
  0xf9   :  { %v344_v45 = vpack.c.bf16 %v319_v43, %v318_v42  ;;  %v1350_v46 = vpop.f32.mrb[16].mxu0  ;;  %1437 = vmatpush3.bf16.msra.mxu1 %v1477_v39 }
  0xfa   :  { %v252_v47 = vadd.f32 %v1350_v46, %v1659_v53  ;;  %v243_v48 = vpop.f32.mrb[17].mxu0  ;;  %1438 = vmatprep.subr.bf16.mxu1 %v1478_v40 }
  0xfb   :  { %v244_v49 = vadd.f32 %v1659_v53, %v243_v48  ;;  %v1351_v50 = vpop.f32.mrb[18].mxu0  ;;  %1380 = vmatprep.mubr.msk.bf16.mxu1 %vm377_vm1, %v344_v45 }
  0xfc   :  { %v255_v51 = vadd.f32 %v1351_v50, %v1659_v53  ;;  %v246_v52 = vpop.f32.mrb[19].mxu0  ;;  %1381 = vmatmul.mubr.msk.bf16.gmra.mrb[12].mxu1 %vm377_vm1, %v345_v44  ;;  %v324_v55 = vmax.f32 %v252_v47, 0.0 }
  0xfd   :  { %v247_v54 = vadd.f32 %v1659_v53, %v246_v52  ;;  %v322_v57 = vmax.f32 %v244_v49, 0.0  ;;  %1439 = vmatpush3.bf16.msra.mxu1 %v1478_v40 }
  0xfe   :  { %v325_v56 = vmax.f32 %v255_v51, 0.0 }
  0xff   :  { %v323_v58 = vmax.f32 %v247_v54, 0.0 }
 0x100   :  { %v347_v59 = vpack.c.bf16 %v325_v56, %v324_v55 }
 0x101   :  { %v346_v60 = vpack.c.bf16 %v323_v58, %v322_v57  ;;  %v1354_v61 = vpop.f32.mrb[20].mxu0 }
 0x102   :  { %v268_v62 = vadd.f32 %v1354_v61, %v1659_v53  ;;  %v259_v63 = vpop.f32.mrb[21].mxu0 }
 0x103   :  { %v260_v0 = vadd.f32 %v1659_v53, %v259_v63  ;;  %v1355_v1 = vpop.f32.mrb[22].mxu0  ;;  %1384 = vmatprep.mubr.msk.bf16.mxu1 %vm377_vm1, %v346_v60 }
 0x104   :  { %v271_v2 = vadd.f32 %v1355_v1, %v1659_v53  ;;  %v262_v3 = vpop.f32.mrb[23].mxu0  ;;  %1385 = vmatmul.mubr.msk.bf16.gmra.mrb[16].mxu1 %vm377_vm1, %v347_v59  ;;  %v328_v5 = vmax.f32 %v268_v62, 0.0 }
 0x105   :  { %v263_v4 = vadd.f32 %v1659_v53, %v262_v3  ;;  %v326_v7 = vmax.f32 %v260_v0, 0.0 }
 0x106   :  { %v329_v6 = vmax.f32 %v271_v2, 0.0 }
 0x107   :  { %v327_v8 = vmax.f32 %v263_v4, 0.0 }
 0x108   :  { %v349_v9 = vpack.c.bf16 %v329_v6, %v328_v5 }
 0x109   :  { %v348_v10 = vpack.c.bf16 %v327_v8, %v326_v7  ;;  %v1358_v11 = vpop.f32.mrb[24].mxu0 }
 0x10a   :  { %v284_v12 = vadd.f32 %v1358_v11, %v1659_v53  ;;  %v275_v13 = vpop.f32.mrb[25].mxu0 }
 0x10b   :  { %v276_v14 = vadd.f32 %v1659_v53, %v275_v13  ;;  %v1359_v15 = vpop.f32.mrb[26].mxu0  ;;  %1388 = vmatprep.mubr.msk.bf16.mxu1 %vm377_vm1, %v348_v10 }
 0x10c   :  { %v287_v16 = vadd.f32 %v1359_v15, %v1659_v53  ;;  %v278_v17 = vpop.f32.mrb[27].mxu0  ;;  %1389 = vmatmul.mubr.msk.bf16.gmra.mrb[20].mxu1 %vm377_vm1, %v349_v9  ;;  %v332_v19 = vmax.f32 %v284_v12, 0.0 }
 0x10d   :  { %v279_v18 = vadd.f32 %v1659_v53, %v278_v17  ;;  %v330_v21 = vmax.f32 %v276_v14, 0.0 }
 0x10e   :  { %v333_v20 = vmax.f32 %v287_v16, 0.0 }
 0x10f   :  { %v331_v22 = vmax.f32 %v279_v18, 0.0 }
 0x110   :  { %v351_v23 = vpack.c.bf16 %v333_v20, %v332_v19 }
 0x111   :  { %v350_v24 = vpack.c.bf16 %v331_v22, %v330_v21  ;;  %v1362_v25 = vpop.f32.mrb[28].mxu0 }
 0x112   :  { %v300_v26 = vadd.f32 %v1362_v25, %v1659_v53  ;;  %v291_v27 = vpop.f32.mrb[29].mxu0 }
 0x113   :  { %v292_v28 = vadd.f32 %v1659_v53, %v291_v27  ;;  %v1363_v29 = vpop.f32.mrb[30].mxu0  ;;  %1392 = vmatprep.mubr.msk.bf16.mxu1 %vm377_vm1, %v350_v24 }
 0x114   :  { %v303_v30 = vadd.f32 %v1363_v29, %v1659_v53  ;;  %v294_v31 = vpop.f32.mrb[31].mxu0  ;;  %1393 = vmatmul.mubr.msk.bf16.gmra.mrb[24].mxu1 %vm377_vm1, %v351_v23  ;;  %v336_v33 = vmax.f32 %v300_v26, 0.0 }
 0x115   :  { %v295_v32 = vadd.f32 %v1659_v53, %v294_v31  ;;  %v334_v35 = vmax.f32 %v292_v28, 0.0  ;;  %v1718_v53 = vld [vmem:[%s1992_s4] ss:$0 sm:$0xff] }
 0x116   :  { %v337_v34 = vmax.f32 %v303_v30, 0.0 }
 0x117   :  { %v335_v36 = vmax.f32 %v295_v32, 0.0 }
 0x118   :  { %v353_v37 = vpack.c.bf16 %v337_v34, %v336_v33 }
 0x119   :  { %v352_v38 = vpack.c.bf16 %v335_v36, %v334_v35 }
 0x11b   :  { %1396 = vmatprep.mubr.msk.bf16.mxu1 %vm377_vm1, %v352_v38 }
 0x11c   :  { %1397 = vmatmul.mubr.msk.bf16.gmra.mrb[28].mxu1 %vm377_vm1, %v353_v37 }
 0x1b7   :  { %v1370_v41 = vpop.f32.mrb[0].mxu1 }
 0x1b8   :  { %v469_v42 = vadd.f32 %v1370_v41, %v1718_v53  ;;  %v460_v43 = vpop.f32.mrb[1].mxu1 }
 0x1b9   :  { %v461_v44 = vadd.f32 %v1718_v53, %v460_v43  ;;  %v1371_v45 = vpop.f32.mrb[2].mxu1 }
 0x1ba   :  { %v472_v46 = vadd.f32 %v1371_v45, %v1718_v53  ;;  %v463_v47 = vpop.f32.mrb[3].mxu1  ;;  %v589_v49 = vmax.f32 %v469_v42, 0.0 }
 0x1bb   :  { %v464_v48 = vadd.f32 %v1718_v53, %v463_v47  ;;  %v587_v51 = vmax.f32 %v461_v44, 0.0 }
 0x1bc   :  { %v590_v50 = vmax.f32 %v472_v46, 0.0 }
 0x1bd   :  { %v588_v52 = vmax.f32 %v464_v48, 0.0 }
 0x1be   :  { %v620_v54 = vpack.c.bf16 %v590_v50, %v589_v49 }
 0x1bf   :  { %v619_v55 = vpack.c.bf16 %v588_v52, %v587_v51  ;;  %v1374_v56 = vpop.f32.mrb[4].mxu1 }
 0x1c0   :  { %v485_v57 = vadd.f32 %v1374_v56, %v1718_v53  ;;  %v476_v58 = vpop.f32.mrb[5].mxu1 }
 0x1c1   :  { %v477_v59 = vadd.f32 %v1718_v53, %v476_v58  ;;  %v1375_v60 = vpop.f32.mrb[6].mxu1  ;;  %1404 = vmatprep.mubr.msk.bf16.mxu0 %vm377_vm1, %v619_v55 }
 0x1c2   :  { %v488_v61 = vadd.f32 %v1375_v60, %v1718_v53  ;;  %v479_v62 = vpop.f32.mrb[7].mxu1  ;;  %1405 = vmatmul.mubr.msk.bf16.vlgmr.msra.gmra.mrb[32].mxu0 %vm377_vm1, %v620_v54  ;;  %v593_v0 = vmax.f32 %v485_v57, 0.0 }
 0x1c3   :  { %v480_v63 = vadd.f32 %v1718_v53, %v479_v62  ;;  %v591_v2 = vmax.f32 %v477_v59, 0.0 }
 0x1c4   :  { %v594_v1 = vmax.f32 %v488_v61, 0.0 }
 0x1c5   :  { %v592_v3 = vmax.f32 %v480_v63, 0.0 }
 0x1c6   :  { %v622_v4 = vpack.c.bf16 %v594_v1, %v593_v0 }
 0x1c7   :  { %v621_v5 = vpack.c.bf16 %v592_v3, %v591_v2  ;;  %v1378_v6 = vpop.f32.mrb[8].mxu1 }
 0x1c8   :  { %v501_v7 = vadd.f32 %v1378_v6, %v1718_v53  ;;  %v492_v8 = vpop.f32.mrb[9].mxu1 }
 0x1c9   :  { %v493_v9 = vadd.f32 %v1718_v53, %v492_v8  ;;  %v1379_v10 = vpop.f32.mrb[10].mxu1  ;;  %1408 = vmatprep.mubr.msk.bf16.mxu0 %vm377_vm1, %v621_v5 }
 0x1ca   :  { %v504_v11 = vadd.f32 %v1379_v10, %v1718_v53  ;;  %v495_v12 = vpop.f32.mrb[11].mxu1  ;;  %1409 = vmatmul.mubr.msk.bf16.gmra.mrb[36].mxu0 %vm377_vm1, %v622_v4  ;;  %v597_v14 = vmax.f32 %v501_v7, 0.0 }
 0x1cb   :  { %v496_v13 = vadd.f32 %v1718_v53, %v495_v12  ;;  %v595_v16 = vmax.f32 %v493_v9, 0.0 }
 0x1cc   :  { %v598_v15 = vmax.f32 %v504_v11, 0.0 }
 0x1cd   :  { %v596_v17 = vmax.f32 %v496_v13, 0.0 }
 0x1ce   :  { %v624_v18 = vpack.c.bf16 %v598_v15, %v597_v14 }
 0x1cf   :  { %v623_v19 = vpack.c.bf16 %v596_v17, %v595_v16  ;;  %v1382_v20 = vpop.f32.mrb[12].mxu1 }
 0x1d0   :  { %v517_v21 = vadd.f32 %v1382_v20, %v1718_v53  ;;  %v508_v22 = vpop.f32.mrb[13].mxu1 }
 0x1d1   :  { %v509_v23 = vadd.f32 %v1718_v53, %v508_v22  ;;  %v1383_v24 = vpop.f32.mrb[14].mxu1  ;;  %1412 = vmatprep.mubr.msk.bf16.mxu0 %vm377_vm1, %v623_v19 }
 0x1d2   :  { %v520_v25 = vadd.f32 %v1383_v24, %v1718_v53  ;;  %v511_v26 = vpop.f32.mrb[15].mxu1  ;;  %1413 = vmatmul.mubr.msk.bf16.gmra.mrb[40].mxu0 %vm377_vm1, %v624_v18  ;;  %v601_v28 = vmax.f32 %v517_v21, 0.0 }
 0x1d3   :  { %v512_v27 = vadd.f32 %v1718_v53, %v511_v26  ;;  %v599_v30 = vmax.f32 %v509_v23, 0.0 }
 0x1d4   :  { %v602_v29 = vmax.f32 %v520_v25, 0.0 }
 0x1d5   :  { %v600_v31 = vmax.f32 %v512_v27, 0.0  ;;  %v1771_v27 = vld [vmem:[%s1993_s6] ss:$0 sm:$0xff] }
 0x1d6   :  { %v626_v32 = vpack.c.bf16 %v602_v29, %v601_v28 }
 0x1d7   :  { %v625_v33 = vpack.c.bf16 %v600_v31, %v599_v30  ;;  %v1386_v34 = vpop.f32.mrb[16].mxu1 }
 0x1d8   :  { %v533_v35 = vadd.f32 %v1386_v34, %v1718_v53  ;;  %v524_v36 = vpop.f32.mrb[17].mxu1 }
 0x1d9   :  { %v525_v37 = vadd.f32 %v1718_v53, %v524_v36  ;;  %v1387_v38 = vpop.f32.mrb[18].mxu1  ;;  %1416 = vmatprep.mubr.msk.bf16.mxu0 %vm377_vm1, %v625_v33 }
 0x1da   :  { %v536_v39 = vadd.f32 %v1387_v38, %v1718_v53  ;;  %v527_v40 = vpop.f32.mrb[19].mxu1  ;;  %1417 = vmatmul.mubr.msk.bf16.gmra.mrb[44].mxu0 %vm377_vm1, %v626_v32  ;;  %v605_v42 = vmax.f32 %v533_v35, 0.0 }
 0x1db   :  { %v528_v41 = vadd.f32 %v1718_v53, %v527_v40  ;;  %v603_v44 = vmax.f32 %v525_v37, 0.0 }
 0x1dc   :  { %v606_v43 = vmax.f32 %v536_v39, 0.0 }
 0x1dd   :  { %v604_v45 = vmax.f32 %v528_v41, 0.0 }
 0x1de   :  { %v628_v46 = vpack.c.bf16 %v606_v43, %v605_v42 }
 0x1df   :  { %v627_v47 = vpack.c.bf16 %v604_v45, %v603_v44  ;;  %v1390_v48 = vpop.f32.mrb[20].mxu1 }
 0x1e0   :  { %v549_v49 = vadd.f32 %v1390_v48, %v1718_v53  ;;  %v540_v50 = vpop.f32.mrb[21].mxu1 }
 0x1e1   :  { %v541_v51 = vadd.f32 %v1718_v53, %v540_v50  ;;  %v1391_v52 = vpop.f32.mrb[22].mxu1  ;;  %1420 = vmatprep.mubr.msk.bf16.mxu0 %vm377_vm1, %v627_v47 }
 0x1e2   :  { %v552_v54 = vadd.f32 %v1391_v52, %v1718_v53  ;;  %v543_v55 = vpop.f32.mrb[23].mxu1  ;;  %1421 = vmatmul.mubr.msk.bf16.gmra.mrb[48].mxu0 %vm377_vm1, %v628_v46  ;;  %v609_v57 = vmax.f32 %v549_v49, 0.0 }
 0x1e3   :  { %v544_v56 = vadd.f32 %v1718_v53, %v543_v55  ;;  %v607_v59 = vmax.f32 %v541_v51, 0.0 }
 0x1e4   :  { %v610_v58 = vmax.f32 %v552_v54, 0.0 }
 0x1e5   :  { %v608_v60 = vmax.f32 %v544_v56, 0.0 }
 0x1e6   :  { %v630_v61 = vpack.c.bf16 %v610_v58, %v609_v57 }
 0x1e7   :  { %v629_v62 = vpack.c.bf16 %v608_v60, %v607_v59  ;;  %v1394_v63 = vpop.f32.mrb[24].mxu1 }
 0x1e8   :  { %v565_v0 = vadd.f32 %v1394_v63, %v1718_v53  ;;  %v556_v1 = vpop.f32.mrb[25].mxu1 }
 0x1e9   :  { %v557_v2 = vadd.f32 %v1718_v53, %v556_v1  ;;  %v1395_v3 = vpop.f32.mrb[26].mxu1  ;;  %1424 = vmatprep.mubr.msk.bf16.mxu0 %vm377_vm1, %v629_v62 }
 0x1ea   :  { %v568_v4 = vadd.f32 %v1395_v3, %v1718_v53  ;;  %v559_v5 = vpop.f32.mrb[27].mxu1  ;;  %1425 = vmatmul.mubr.msk.bf16.gmra.mrb[52].mxu0 %vm377_vm1, %v630_v61  ;;  %v613_v7 = vmax.f32 %v565_v0, 0.0 }
 0x1eb   :  { %v560_v6 = vadd.f32 %v1718_v53, %v559_v5  ;;  %v611_v9 = vmax.f32 %v557_v2, 0.0 }
 0x1ec   :  { %v614_v8 = vmax.f32 %v568_v4, 0.0 }
 0x1ed   :  { %v612_v10 = vmax.f32 %v560_v6, 0.0 }
 0x1ee   :  { %v632_v11 = vpack.c.bf16 %v614_v8, %v613_v7 }
 0x1ef   :  { %v631_v12 = vpack.c.bf16 %v612_v10, %v611_v9  ;;  %v1398_v13 = vpop.f32.mrb[28].mxu1 }
 0x1f0   :  { %v581_v14 = vadd.f32 %v1398_v13, %v1718_v53  ;;  %v572_v15 = vpop.f32.mrb[29].mxu1 }
 0x1f1   :  { %v573_v16 = vadd.f32 %v1718_v53, %v572_v15  ;;  %v1399_v17 = vpop.f32.mrb[30].mxu1  ;;  %1428 = vmatprep.mubr.msk.bf16.mxu0 %vm377_vm1, %v631_v12 }
 0x1f2   :  { %v584_v18 = vadd.f32 %v1399_v17, %v1718_v53  ;;  %v575_v19 = vpop.f32.mrb[31].mxu1  ;;  %1429 = vmatmul.mubr.msk.bf16.gmra.mrb[56].mxu0 %vm377_vm1, %v632_v11  ;;  %v617_v21 = vmax.f32 %v581_v14, 0.0 }
 0x1f3   :  { %v576_v20 = vadd.f32 %v1718_v53, %v575_v19  ;;  %v615_v23 = vmax.f32 %v573_v16, 0.0 }
 0x1f4   :  { %v618_v22 = vmax.f32 %v584_v18, 0.0 }
 0x1f5   :  { %v616_v24 = vmax.f32 %v576_v20, 0.0 }
 0x1f6   :  { %v634_v25 = vpack.c.bf16 %v618_v22, %v617_v21 }
 0x1f7   :  { %v633_v26 = vpack.c.bf16 %v616_v24, %v615_v23 }
 0x1f9   :  { %1432 = vmatprep.mubr.msk.bf16.mxu0 %vm377_vm1, %v633_v26 }
 0x1fa   :  { %1433 = vmatmul.mubr.msk.bf16.gmra.mrb[60].mxu0 %vm377_vm1, %v634_v25 }
 0x295   :  { %v1406_v28 = vpop.f32.mrb[32].mxu0 }
 0x296   :  { %v749_v29 = vadd.f32 %v1406_v28, %v1771_v27  ;;  %v740_v30 = vpop.f32.mrb[33].mxu0 }
 0x297   :  { %v741_v53 = vadd.f32 %v1771_v27, %v740_v30  ;;  %v1407_v31 = vpop.f32.mrb[34].mxu0 }
 0x298   :  { %v752_v32 = vadd.f32 %v1407_v31, %v1771_v27  ;;  %v743_v33 = vpop.f32.mrb[35].mxu0  ;;  %v869_v35 = vmax.f32 %v749_v29, 0.0 }
 0x299   :  { %v744_v34 = vadd.f32 %v1771_v27, %v743_v33  ;;  %v867_v37 = vmax.f32 %v741_v53, 0.0 }
 0x29a   :  { %v870_v36 = vmax.f32 %v752_v32, 0.0 }
 0x29b   :  { %v868_v38 = vmax.f32 %v744_v34, 0.0 }
 0x29c   :  { %v900_v39 = vpack.c.bf16 %v870_v36, %v869_v35 }
 0x29d   :  { %v899_v40 = vpack.c.bf16 %v868_v38, %v867_v37  ;;  %v1410_v41 = vpop.f32.mrb[36].mxu0 }
 0x29e   :  { %v765_v42 = vadd.f32 %v1410_v41, %v1771_v27  ;;  %v756_v43 = vpop.f32.mrb[37].mxu0 }
 0x29f   :  { %v757_v44 = vadd.f32 %v1771_v27, %v756_v43  ;;  %v1411_v45 = vpop.f32.mrb[38].mxu0  ;;  %1440 = vmatprep.mubr.msk.bf16.mxu1 %vm377_vm1, %v899_v40 }
 0x2a0   :  { %v768_v46 = vadd.f32 %v1411_v45, %v1771_v27  ;;  %v759_v47 = vpop.f32.mrb[39].mxu0  ;;  %1441 = vmatmul.mubr.msk.bf16.vlgmr.msra.gmra.mrb[32].mxu1 %vm377_vm1, %v900_v39  ;;  %v873_v49 = vmax.f32 %v765_v42, 0.0 }
 0x2a1   :  { %v760_v48 = vadd.f32 %v1771_v27, %v759_v47  ;;  %v871_v51 = vmax.f32 %v757_v44, 0.0 }
 0x2a2   :  { %v874_v50 = vmax.f32 %v768_v46, 0.0 }
 0x2a3   :  { %v872_v52 = vmax.f32 %v760_v48, 0.0 }
 0x2a4   :  { %v902_v54 = vpack.c.bf16 %v874_v50, %v873_v49 }
 0x2a5   :  { %v901_v55 = vpack.c.bf16 %v872_v52, %v871_v51  ;;  %v1414_v56 = vpop.f32.mrb[40].mxu0 }
 0x2a6   :  { %v781_v57 = vadd.f32 %v1414_v56, %v1771_v27  ;;  %v772_v58 = vpop.f32.mrb[41].mxu0 }
 0x2a7   :  { %v773_v59 = vadd.f32 %v1771_v27, %v772_v58  ;;  %v1415_v60 = vpop.f32.mrb[42].mxu0  ;;  %1444 = vmatprep.mubr.msk.bf16.mxu1 %vm377_vm1, %v901_v55 }
 0x2a8   :  { %v784_v61 = vadd.f32 %v1415_v60, %v1771_v27  ;;  %v775_v62 = vpop.f32.mrb[43].mxu0  ;;  %1445 = vmatmul.mubr.msk.bf16.gmra.mrb[36].mxu1 %vm377_vm1, %v902_v54  ;;  %v877_v0 = vmax.f32 %v781_v57, 0.0 }
 0x2a9   :  { %v776_v63 = vadd.f32 %v1771_v27, %v775_v62  ;;  %v875_v2 = vmax.f32 %v773_v59, 0.0 }
 0x2aa   :  { %v878_v1 = vmax.f32 %v784_v61, 0.0 }
 0x2ab   :  { %v876_v3 = vmax.f32 %v776_v63, 0.0 }
 0x2ac   :  { %v904_v4 = vpack.c.bf16 %v878_v1, %v877_v0 }
 0x2ad   :  { %v903_v5 = vpack.c.bf16 %v876_v3, %v875_v2  ;;  %v1418_v6 = vpop.f32.mrb[44].mxu0 }
 0x2ae   :  { %v797_v7 = vadd.f32 %v1418_v6, %v1771_v27  ;;  %v788_v8 = vpop.f32.mrb[45].mxu0 }
 0x2af   :  { %v789_v9 = vadd.f32 %v1771_v27, %v788_v8  ;;  %v1419_v10 = vpop.f32.mrb[46].mxu0  ;;  %1448 = vmatprep.mubr.msk.bf16.mxu1 %vm377_vm1, %v903_v5 }
 0x2b0   :  { %v800_v11 = vadd.f32 %v1419_v10, %v1771_v27  ;;  %v791_v12 = vpop.f32.mrb[47].mxu0  ;;  %1449 = vmatmul.mubr.msk.bf16.gmra.mrb[40].mxu1 %vm377_vm1, %v904_v4  ;;  %v881_v14 = vmax.f32 %v797_v7, 0.0 }
 0x2b1   :  { %v792_v13 = vadd.f32 %v1771_v27, %v791_v12  ;;  %v879_v16 = vmax.f32 %v789_v9, 0.0 }
 0x2b2   :  { %v882_v15 = vmax.f32 %v800_v11, 0.0 }
 0x2b3   :  { %v880_v17 = vmax.f32 %v792_v13, 0.0  ;;  %v1824_v13 = vld [vmem:[%s1994_s8] ss:$0 sm:$0xff] }
 0x2b4   :  { %v906_v18 = vpack.c.bf16 %v882_v15, %v881_v14 }
 0x2b5   :  { %v905_v19 = vpack.c.bf16 %v880_v17, %v879_v16  ;;  %v1422_v20 = vpop.f32.mrb[48].mxu0 }
 0x2b6   :  { %v813_v21 = vadd.f32 %v1422_v20, %v1771_v27  ;;  %v804_v22 = vpop.f32.mrb[49].mxu0 }
 0x2b7   :  { %v805_v23 = vadd.f32 %v1771_v27, %v804_v22  ;;  %v1423_v24 = vpop.f32.mrb[50].mxu0  ;;  %1452 = vmatprep.mubr.msk.bf16.mxu1 %vm377_vm1, %v905_v19 }
 0x2b8   :  { %v816_v25 = vadd.f32 %v1423_v24, %v1771_v27  ;;  %v807_v26 = vpop.f32.mrb[51].mxu0  ;;  %1453 = vmatmul.mubr.msk.bf16.gmra.mrb[44].mxu1 %vm377_vm1, %v906_v18  ;;  %v885_v29 = vmax.f32 %v813_v21, 0.0 }
 0x2b9   :  { %v808_v28 = vadd.f32 %v1771_v27, %v807_v26  ;;  %v883_v53 = vmax.f32 %v805_v23, 0.0 }
 0x2ba   :  { %v886_v30 = vmax.f32 %v816_v25, 0.0 }
 0x2bb   :  { %v884_v31 = vmax.f32 %v808_v28, 0.0 }
 0x2bc   :  { %v908_v32 = vpack.c.bf16 %v886_v30, %v885_v29 }
 0x2bd   :  { %v907_v33 = vpack.c.bf16 %v884_v31, %v883_v53  ;;  %v1426_v34 = vpop.f32.mrb[52].mxu0 }
 0x2be   :  { %v829_v35 = vadd.f32 %v1426_v34, %v1771_v27  ;;  %v820_v36 = vpop.f32.mrb[53].mxu0 }
 0x2bf   :  { %v821_v37 = vadd.f32 %v1771_v27, %v820_v36  ;;  %v1427_v38 = vpop.f32.mrb[54].mxu0  ;;  %1456 = vmatprep.mubr.msk.bf16.mxu1 %vm377_vm1, %v907_v33 }
 0x2c0   :  { %v832_v39 = vadd.f32 %v1427_v38, %v1771_v27  ;;  %v823_v40 = vpop.f32.mrb[55].mxu0  ;;  %1457 = vmatmul.mubr.msk.bf16.gmra.mrb[48].mxu1 %vm377_vm1, %v908_v32  ;;  %v889_v42 = vmax.f32 %v829_v35, 0.0 }
 0x2c1   :  { %v824_v41 = vadd.f32 %v1771_v27, %v823_v40  ;;  %v887_v44 = vmax.f32 %v821_v37, 0.0 }
 0x2c2   :  { %v890_v43 = vmax.f32 %v832_v39, 0.0 }
 0x2c3   :  { %v888_v45 = vmax.f32 %v824_v41, 0.0 }
 0x2c4   :  { %v910_v46 = vpack.c.bf16 %v890_v43, %v889_v42 }
 0x2c5   :  { %v909_v47 = vpack.c.bf16 %v888_v45, %v887_v44  ;;  %v1430_v48 = vpop.f32.mrb[56].mxu0 }
 0x2c6   :  { %v845_v49 = vadd.f32 %v1430_v48, %v1771_v27  ;;  %v836_v50 = vpop.f32.mrb[57].mxu0 }
 0x2c7   :  { %v837_v51 = vadd.f32 %v1771_v27, %v836_v50  ;;  %v1431_v52 = vpop.f32.mrb[58].mxu0  ;;  %1460 = vmatprep.mubr.msk.bf16.mxu1 %vm377_vm1, %v909_v47 }
 0x2c8   :  { %v848_v54 = vadd.f32 %v1431_v52, %v1771_v27  ;;  %v839_v55 = vpop.f32.mrb[59].mxu0  ;;  %1461 = vmatmul.mubr.msk.bf16.gmra.mrb[52].mxu1 %vm377_vm1, %v910_v46  ;;  %v893_v57 = vmax.f32 %v845_v49, 0.0 }
 0x2c9   :  { %v840_v56 = vadd.f32 %v1771_v27, %v839_v55  ;;  %v891_v59 = vmax.f32 %v837_v51, 0.0 }
 0x2ca   :  { %v894_v58 = vmax.f32 %v848_v54, 0.0 }
 0x2cb   :  { %v892_v60 = vmax.f32 %v840_v56, 0.0 }
 0x2cc   :  { %v912_v61 = vpack.c.bf16 %v894_v58, %v893_v57 }
 0x2cd   :  { %v911_v62 = vpack.c.bf16 %v892_v60, %v891_v59  ;;  %v1434_v63 = vpop.f32.mrb[60].mxu0 }
 0x2ce   :  { %v861_v0 = vadd.f32 %v1434_v63, %v1771_v27  ;;  %v852_v1 = vpop.f32.mrb[61].mxu0 }
 0x2cf   :  { %v853_v2 = vadd.f32 %v1771_v27, %v852_v1  ;;  %v1435_v3 = vpop.f32.mrb[62].mxu0  ;;  %1464 = vmatprep.mubr.msk.bf16.mxu1 %vm377_vm1, %v911_v62 }
 0x2d0   :  { %v864_v4 = vadd.f32 %v1435_v3, %v1771_v27  ;;  %v855_v5 = vpop.f32.mrb[63].mxu0  ;;  %1465 = vmatmul.mubr.msk.bf16.gmra.mrb[56].mxu1 %vm377_vm1, %v912_v61  ;;  %v897_v7 = vmax.f32 %v861_v0, 0.0 }
 0x2d1   :  { %v856_v6 = vadd.f32 %v1771_v27, %v855_v5  ;;  %v895_v9 = vmax.f32 %v853_v2, 0.0 }
 0x2d2   :  { %v898_v8 = vmax.f32 %v864_v4, 0.0 }
 0x2d3   :  { %v896_v10 = vmax.f32 %v856_v6, 0.0 }
 0x2d4   :  { %v914_v11 = vpack.c.bf16 %v898_v8, %v897_v7 }
 0x2d5   :  { %v913_v12 = vpack.c.bf16 %v896_v10, %v895_v9 }
 0x2d7   :  { %1468 = vmatprep.mubr.msk.bf16.mxu1 %vm377_vm1, %v913_v12 }
 0x2d8   :  { %1469 = vmatmul.mubr.msk.bf16.gmra.mrb[60].mxu1 %vm377_vm1, %v914_v11 }
 0x373   :  { %v1442_v14 = vpop.f32.mrb[32].mxu1 }
 0x374   :  { %v1029_v15 = vadd.f32 %v1442_v14, %v1824_v13  ;;  %v1020_v27 = vpop.f32.mrb[33].mxu1 }
 0x375   :  { %v1021_v16 = vadd.f32 %v1824_v13, %v1020_v27  ;;  %v1443_v17 = vpop.f32.mrb[34].mxu1 }
 0x376   :  { %1150 = vst.msk [vmem:[%s1995_s9 + $0x10] sm:$0xff] %vm1147_vm2, %v1029_v15  ;;  %v1032_v18 = vadd.f32 %v1443_v17, %v1824_v13  ;;  %v1023_v19 = vpop.f32.mrb[35].mxu1 }
 0x377   :  { %1148 = vst.msk [vmem:[%s1995_s9] sm:$0xff] %vm1147_vm2, %v1021_v16  ;;  %v1024_v20 = vadd.f32 %v1824_v13, %v1023_v19 }
 0x378   :  { %1151 = vst.msk [vmem:[%s1995_s9 + $0x18] sm:$0xff] %vm1147_vm2, %v1032_v18 }
 0x379   :  { %1149 = vst.msk [vmem:[%s1995_s9 + $0x8] sm:$0xff] %vm1147_vm2, %v1024_v20 }
 0x37b   :  { %v1446_v21 = vpop.f32.mrb[36].mxu1 }
 0x37c   :  { %v1045_v22 = vadd.f32 %v1446_v21, %v1824_v13  ;;  %v1036_v23 = vpop.f32.mrb[37].mxu1 }
 0x37d   :  { %v1037_v24 = vadd.f32 %v1824_v13, %v1036_v23  ;;  %v1447_v25 = vpop.f32.mrb[38].mxu1 }
 0x37e   :  { %1154 = vst.msk [vmem:[%s1995_s9 + $0x30] sm:$0xff] %vm1147_vm2, %v1045_v22  ;;  %v1048_v26 = vadd.f32 %v1447_v25, %v1824_v13  ;;  %v1039_v28 = vpop.f32.mrb[39].mxu1 }
 0x37f   :  { %1152 = vst.msk [vmem:[%s1995_s9 + $0x20] sm:$0xff] %vm1147_vm2, %v1037_v24  ;;  %v1040_v29 = vadd.f32 %v1824_v13, %v1039_v28 }
 0x380   :  { %1155 = vst.msk [vmem:[%s1995_s9 + $0x38] sm:$0xff] %vm1147_vm2, %v1048_v26 }
 0x381   :  { %1153 = vst.msk [vmem:[%s1995_s9 + $0x28] sm:$0xff] %vm1147_vm2, %v1040_v29 }
 0x383   :  { %v1450_v30 = vpop.f32.mrb[40].mxu1 }
 0x384   :  { %v1061_v53 = vadd.f32 %v1450_v30, %v1824_v13  ;;  %v1052_v31 = vpop.f32.mrb[41].mxu1 }
 0x385   :  { %v1053_v32 = vadd.f32 %v1824_v13, %v1052_v31  ;;  %v1451_v33 = vpop.f32.mrb[42].mxu1 }
 0x386   :  { %1158 = vst.msk [vmem:[%s1995_s9 + $0x50] sm:$0xff] %vm1147_vm2, %v1061_v53  ;;  %v1064_v34 = vadd.f32 %v1451_v33, %v1824_v13  ;;  %v1055_v35 = vpop.f32.mrb[43].mxu1 }
 0x387   :  { %1156 = vst.msk [vmem:[%s1995_s9 + $0x40] sm:$0xff] %vm1147_vm2, %v1053_v32  ;;  %v1056_v36 = vadd.f32 %v1824_v13, %v1055_v35 }
 0x388   :  { %1159 = vst.msk [vmem:[%s1995_s9 + $0x58] sm:$0xff] %vm1147_vm2, %v1064_v34 }
 0x389   :  { %1157 = vst.msk [vmem:[%s1995_s9 + $0x48] sm:$0xff] %vm1147_vm2, %v1056_v36 }
 0x38b   :  { %v1454_v37 = vpop.f32.mrb[44].mxu1 }
 0x38c   :  { %v1077_v38 = vadd.f32 %v1454_v37, %v1824_v13  ;;  %v1068_v39 = vpop.f32.mrb[45].mxu1 }
 0x38d   :  { %v1069_v40 = vadd.f32 %v1824_v13, %v1068_v39  ;;  %v1455_v41 = vpop.f32.mrb[46].mxu1 }
 0x38e   :  { %1162 = vst.msk [vmem:[%s1995_s9 + $0x70] sm:$0xff] %vm1147_vm2, %v1077_v38  ;;  %v1080_v42 = vadd.f32 %v1455_v41, %v1824_v13  ;;  %v1071_v43 = vpop.f32.mrb[47].mxu1 }
 0x38f   :  { %1160 = vst.msk [vmem:[%s1995_s9 + $0x60] sm:$0xff] %vm1147_vm2, %v1069_v40  ;;  %v1072_v44 = vadd.f32 %v1824_v13, %v1071_v43 }
 0x390   :  { %1163 = vst.msk [vmem:[%s1995_s9 + $0x78] sm:$0xff] %vm1147_vm2, %v1080_v42 }
 0x391   :  { %1161 = vst.msk [vmem:[%s1995_s9 + $0x68] sm:$0xff] %vm1147_vm2, %v1072_v44 }
 0x393   :  { %v1458_v45 = vpop.f32.mrb[48].mxu1 }
 0x394   :  { %v1093_v46 = vadd.f32 %v1458_v45, %v1824_v13  ;;  %v1084_v47 = vpop.f32.mrb[49].mxu1 }
 0x395   :  { %v1085_v48 = vadd.f32 %v1824_v13, %v1084_v47  ;;  %v1459_v49 = vpop.f32.mrb[50].mxu1 }
 0x396   :  { %1166 = vst.msk [vmem:[%s1995_s9 + $0x90] sm:$0xff] %vm1147_vm2, %v1093_v46  ;;  %v1096_v50 = vadd.f32 %v1459_v49, %v1824_v13  ;;  %v1087_v51 = vpop.f32.mrb[51].mxu1 }
 0x397   :  { %1164 = vst.msk [vmem:[%s1995_s9 + $0x80] sm:$0xff] %vm1147_vm2, %v1085_v48  ;;  %v1088_v52 = vadd.f32 %v1824_v13, %v1087_v51 }
 0x398   :  { %1167 = vst.msk [vmem:[%s1995_s9 + $0x98] sm:$0xff] %vm1147_vm2, %v1096_v50 }
 0x399   :  { %1165 = vst.msk [vmem:[%s1995_s9 + $0x88] sm:$0xff] %vm1147_vm2, %v1088_v52 }
 0x39b   :  { %v1462_v54 = vpop.f32.mrb[52].mxu1 }
 0x39c   :  { %v1109_v55 = vadd.f32 %v1462_v54, %v1824_v13  ;;  %v1100_v56 = vpop.f32.mrb[53].mxu1 }
 0x39d   :  { %v1101_v57 = vadd.f32 %v1824_v13, %v1100_v56  ;;  %v1463_v58 = vpop.f32.mrb[54].mxu1 }
 0x39e   :  { %1170 = vst.msk [vmem:[%s1995_s9 + $0xb0] sm:$0xff] %vm1147_vm2, %v1109_v55  ;;  %v1112_v59 = vadd.f32 %v1463_v58, %v1824_v13  ;;  %v1103_v60 = vpop.f32.mrb[55].mxu1 }
 0x39f   :  { %1168 = vst.msk [vmem:[%s1995_s9 + $0xa0] sm:$0xff] %vm1147_vm2, %v1101_v57  ;;  %v1104_v61 = vadd.f32 %v1824_v13, %v1103_v60 }
 0x3a0   :  { %1171 = vst.msk [vmem:[%s1995_s9 + $0xb8] sm:$0xff] %vm1147_vm2, %v1112_v59 }
 0x3a1   :  { %1169 = vst.msk [vmem:[%s1995_s9 + $0xa8] sm:$0xff] %vm1147_vm2, %v1104_v61 }
 0x3a3   :  { %v1466_v62 = vpop.f32.mrb[56].mxu1 }
 0x3a4   :  { %v1125_v63 = vadd.f32 %v1466_v62, %v1824_v13  ;;  %v1116_v0 = vpop.f32.mrb[57].mxu1 }
 0x3a5   :  { %v1117_v1 = vadd.f32 %v1824_v13, %v1116_v0  ;;  %v1467_v2 = vpop.f32.mrb[58].mxu1 }
 0x3a6   :  { %1174 = vst.msk [vmem:[%s1995_s9 + $0xd0] sm:$0xff] %vm1147_vm2, %v1125_v63  ;;  %v1128_v3 = vadd.f32 %v1467_v2, %v1824_v13  ;;  %v1119_v4 = vpop.f32.mrb[59].mxu1 }
 0x3a7   :  { %1172 = vst.msk [vmem:[%s1995_s9 + $0xc0] sm:$0xff] %vm1147_vm2, %v1117_v1  ;;  %v1120_v5 = vadd.f32 %v1824_v13, %v1119_v4 }
 0x3a8   :  { %1175 = vst.msk [vmem:[%s1995_s9 + $0xd8] sm:$0xff] %vm1147_vm2, %v1128_v3 }
 0x3a9   :  { %1173 = vst.msk [vmem:[%s1995_s9 + $0xc8] sm:$0xff] %vm1147_vm2, %v1120_v5 }
 0x3ab   :  { %v1470_v6 = vpop.f32.mrb[60].mxu1 }
 0x3ac   :  { %v1141_v7 = vadd.f32 %v1470_v6, %v1824_v13  ;;  %v1132_v8 = vpop.f32.mrb[61].mxu1 }
 0x3ad   :  { %v1133_v9 = vadd.f32 %v1824_v13, %v1132_v8  ;;  %v1471_v10 = vpop.f32.mrb[62].mxu1 }
 0x3ae   :  { %1178 = vst.msk [vmem:[%s1995_s9 + $0xf0] sm:$0xff] %vm1147_vm2, %v1141_v7  ;;  %v1144_v11 = vadd.f32 %v1471_v10, %v1824_v13  ;;  %v1135_v12 = vpop.f32.mrb[63].mxu1 }
 0x3af   :  { %1176 = vst.msk [vmem:[%s1995_s9 + $0xe0] sm:$0xff] %vm1147_vm2, %v1133_v9  ;;  %v1136_v14 = vadd.f32 %v1824_v13, %v1135_v12 }
 0x3b0   :  { %1179 = vst.msk [vmem:[%s1995_s9 + $0xf8] sm:$0xff] %vm1147_vm2, %v1144_v11 }
 0x3b1   :  { %1177 = vst.msk [vmem:[%s1995_s9 + $0xe8] sm:$0xff] %vm1147_vm2, %v1136_v14 }

</bundles_post_ra>
